<compile_context>
chip_gen: v5e
topology: v5e:2x2
jax: 0.10.0
libtpu: 0.0.40
codegen_flags: <defaults>
</compile_context>

<pallas_src>
import jax
import jax.numpy as jnp
from jax.experimental import pallas as pl
from jax.experimental.pallas import tpu as pltpu

_LANES = 128
_SUBLANES = 8
_MIN_ROWS_FOR_SPLIT = 64  # only force >=2 grid steps once there is meaningful data


def _round_up(x, k):
    return ((x + k - 1) // k) * k


def _verify_robustness_kernel(tb_ref, b_ref, o_ref):
    # tb_ref: SMEM (2,)          -> (l_true, u_true) scalars
    # b_ref : VMEM [2, br, 128]  -> slab 0 = u_j, slab 1 = l_j (swap folded in wrapper)
    # o_ref : VMEM [2, br, 128]  -> slab 0 = lower_j, slab 1 = upper_j
    o_ref[0] = (tb_ref[0] - b_ref[0]).astype(o_ref.dtype)  # lower = l_true - u_j
    o_ref[1] = (tb_ref[1] - b_ref[1]).astype(o_ref.dtype)  # upper = u_true - l_j


def verify_robustness(bounds, true_label: int, *, block_rows: int = 2048):
    """bounds: [N, 2] (lower, upper). Returns [N-1, 2] (lower, upper) per non-true class."""
    true_label = int(true_label)  # must be a static Python int (used in Python slicing)
    n = bounds.shape[0]
    assert n >= 2, "need at least two classes"
    m = n - 1
    dt = bounds.dtype

    # (l_true, u_true) -> SMEM scalars (kept on the scalar path, always 32-bit).
    tb = bounds[true_label].astype(jnp.float32)                                   # [2]

    # Drop the true-label row; swap columns so the kernel is a single subtract per slab.
    b_rest = jnp.concatenate([bounds[:true_label], bounds[true_label + 1:]], 0)   # [m, 2]
    b_swapped = b_rest[:, ::-1].T                                                 # [2, m] row0=u_j, row1=l_j

    # Pack the class axis into full (8,128) vregs: [2, rows_pad, 128].
    rows = pl.cdiv(m, _LANES)
    if rows <= _SUBLANES:
        rows_pad = rows
        br = rows                      # single tiny block (block == full array is allowed)
    else:
        rows_pad = _round_up(rows, _SUBLANES)
        br = min(block_rows, rows_pad)
        if br == rows_pad and rows_pad >= _MIN_ROWS_FOR_SPLIT:
            # >= 2 grid steps so the "parallel" axis can shard across v7x's 2 TensorCores.
            br = _round_up(pl.cdiv(rows_pad, 2), _SUBLANES)
    grid_m = pl.cdiv(rows_pad, br)

    m_pad = rows_pad * _LANES
    if m_pad != m:
        b_swapped = jnp.pad(b_swapped, ((0, 0), (0, m_pad - m)))
    b_packed = b_swapped.reshape(2, rows_pad, _LANES)

    out_packed = pl.pallas_call(
        _verify_robustness_kernel,
        out_shape=jax.ShapeDtypeStruct((2, rows_pad, _LANES), dt),
        grid=(grid_m,),
        in_specs=[
            pl.BlockSpec(memory_space=pltpu.MemorySpace.SMEM),       # (2,) true-label pair
            pl.BlockSpec((2, br, _LANES), lambda i: (0, i, 0)),
        ],
        out_specs=pl.BlockSpec((2, br, _LANES), lambda i: (0, i, 0)),
        compiler_params=pltpu.CompilerParams(
            dimension_semantics=("parallel",),
            # Per-step budget at br=2048: 2 bufs x (2 MiB in + 2 MiB out) = 8 MiB,
            # under v5e's 16 MiB scoped default; explicit limit documents headroom.
            vmem_limit_bytes=32 * 1024 * 1024,
        ),
    )(tb, b_packed)

    # Back to the PyTorch layout: [N-1, 2], col 0 = lower, col 1 = upper.
    return out_packed.reshape(2, m_pad)[:, :m].T


def _reference_dense(bounds, true_label):
    """Pure-jnp mirror of the PyTorch forward (dense W, clamps, matmuls)."""
    n = bounds.shape[0]
    w = jnp.diag(jnp.full((n,), -1.0, dtype=bounds.dtype))
    w = w.at[:, true_label].set(1.0)
    w = jnp.concatenate([w[:true_label], w[true_label + 1:]], axis=0)
    pos = jnp.maximum(w, 0.0)   # torch.clamp(W, min=0)
    neg = jnp.minimum(w, 0.0)   # torch.clamp(W, max=0)
    lower = pos @ bounds[:, 0] + neg @ bounds[:, 1]
    upper = pos @ bounds[:, 1] + neg @ bounds[:, 0]
    return jnp.stack([lower, upper], axis=1)


def _reference_closed(bounds, true_label):
    """Closed-form reference (cheap, used for larger N)."""
    l_true, u_true = bounds[true_label, 0], bounds[true_label, 1]
    b_rest = jnp.concatenate([bounds[:true_label], bounds[true_label + 1:]], 0)
    return jnp.stack([l_true - b_rest[:, 1], u_true - b_rest[:, 0]], axis=1)


def _make_bounds(key, n):
    k1, k2 = jax.random.split(key)
    lo = jax.random.normal(k1, (n,), dtype=jnp.float32)
    width = jnp.abs(jax.random.normal(k2, (n,), dtype=jnp.float32))
    hi = lo + width
    return jnp.stack([lo, hi], axis=1)   # [N, 2], column 0 <= column 1


if __name__ == "__main__":
    key = jax.random.PRNGKey(0)

    # Case 1: typical classifier head (N=10), single tiny block.
    b1 = _make_bounds(jax.random.fold_in(key, 0), 10)
    o1 = jax.block_until_ready(verify_robustness(b1, 3))
    assert o1.shape == (9, 2)
    assert jnp.allclose(o1, _reference_dense(b1, 3), atol=1e-5, rtol=1e-5), "mismatch (N=10)"
    assert jnp.allclose(_reference_closed(b1, 3), _reference_dense(b1, 3), atol=1e-5, rtol=1e-5)

    # Case 2: N=300 -> lane padding within a single block (rows=3).
    b2 = _make_bounds(jax.random.fold_in(key, 1), 300)
    o2 = jax.block_until_ready(verify_robustness(b2, 7))
    assert o2.shape == (299, 2)
    assert jnp.allclose(o2, _reference_dense(b2, 7), atol=1e-5, rtol=1e-5), "mismatch (N=300)"

    # Case 3: N=3000 with a small block -> multi-step grid incl. a partial last block.
    b3 = _make_bounds(jax.random.fold_in(key, 2), 3000)
    o3 = jax.block_until_ready(verify_robustness(b3, 11, block_rows=16))
    assert o3.shape == (2999, 2)
    assert jnp.allclose(o3, _reference_dense(b3, 11), atol=1e-5, rtol=1e-5), "mismatch (N=3000)"

    # Case 4: N=8193 -> exercises the ">=2 parallel steps" split path (rows_pad=64 -> 2x32).
    b4 = _make_bounds(jax.random.fold_in(key, 3), 8193)
    o4 = jax.block_until_ready(verify_robustness(b4, 123))
    assert o4.shape == (8192, 2)
    assert jnp.allclose(o4, _reference_closed(b4, 123), atol=1e-5, rtol=1e-5), "mismatch (N=8193)"

    print("KERNEL_OK")
</pallas_src>

<mosaic_0001>
module attributes {stable_mosaic.version = 11 : i64} {
  func.func @_verify_robustness_kernel(%arg0: i32, %arg1: memref<2xf32, #tpu.memory_space<smem>>, %arg2: memref<2x1x128xf32, #tpu.memory_space<vmem>>, %arg3: memref<2x1x128xf32, #tpu.memory_space<vmem>>) attributes {dimension_semantics = [#tpu.dimension_semantics<parallel>], iteration_bounds = array<i64: 1>, scalar_prefetch = 0 : i64, scratch_operands = 0 : i64, tpu.core_type = #tpu.core_type<tc>, window_params = [{transform_indices = @transform_0, window_bounds = array<i64: 2>}, {transform_indices = @transform_1, window_bounds = array<i64: 2, 1, 128>}, {transform_indices = @transform_2, window_bounds = array<i64: 2, 1, 128>}]} {
    %c0 = arith.constant 0 : index
    %0 = memref.load %arg1[%c0] : memref<2xf32, #tpu.memory_space<smem>>
    %c0_0 = arith.constant 0 : index
    %c0_1 = arith.constant 0 : index
    %c0_2 = arith.constant 0 : index
    %1 = vector.load %arg2[%c0_0, %c0_1, %c0_2] : memref<2x1x128xf32, #tpu.memory_space<vmem>>, vector<1x1x128xf32>
    %2 = vector.shape_cast %1 : vector<1x1x128xf32> to vector<1x128xf32>
    %3 = vector.broadcast %0 : f32 to vector<1x128xf32>
    %4 = arith.subf %3, %2 : vector<1x128xf32>
    %c0_3 = arith.constant 0 : index
    %c0_4 = arith.constant 0 : index
    %c0_5 = arith.constant 0 : index
    %5 = vector.load %arg3[%c0_3, %c0_4, %c0_5] : memref<2x1x128xf32, #tpu.memory_space<vmem>>, vector<1x1x128xf32>
    %6 = vector.shape_cast %5 : vector<1x1x128xf32> to vector<1x128xf32>
    %7 = vector.shape_cast %4 : vector<1x128xf32> to vector<1x1x128xf32>
    tpu.vector_store %arg3[%c0_3, %c0_4, %c0_5], %7 {strides = array<i32>} : memref<2x1x128xf32, #tpu.memory_space<vmem>>, vector<1x1x128xf32>,
    %c1 = arith.constant 1 : index
    %8 = memref.load %arg1[%c1] : memref<2xf32, #tpu.memory_space<smem>>
    %c1_6 = arith.constant 1 : index
    %c0_7 = arith.constant 0 : index
    %c0_8 = arith.constant 0 : index
    %9 = vector.load %arg2[%c1_6, %c0_7, %c0_8] : memref<2x1x128xf32, #tpu.memory_space<vmem>>, vector<1x1x128xf32>
    %10 = vector.shape_cast %9 : vector<1x1x128xf32> to vector<1x128xf32>
    %11 = vector.broadcast %8 : f32 to vector<1x128xf32>
    %12 = arith.subf %11, %10 : vector<1x128xf32>
    %c1_9 = arith.constant 1 : index
    %c0_10 = arith.constant 0 : index
    %c0_11 = arith.constant 0 : index
    %13 = vector.load %arg3[%c1_9, %c0_10, %c0_11] : memref<2x1x128xf32, #tpu.memory_space<vmem>>, vector<1x1x128xf32>
    %14 = vector.shape_cast %13 : vector<1x1x128xf32> to vector<1x128xf32>
    %15 = vector.shape_cast %12 : vector<1x128xf32> to vector<1x1x128xf32>
    tpu.vector_store %arg3[%c1_9, %c0_10, %c0_11], %15 {strides = array<i32>} : memref<2x1x128xf32, #tpu.memory_space<vmem>>, vector<1x1x128xf32>,
    return
  }
  func.func @transform_0(%arg0: i32) -> i32 {
    %c0_i32 = arith.constant 0 : i32
    %c0_i32_0 = arith.constant 0 : i32
    return %c0_i32 : i32
  }
  func.func @transform_1(%arg0: i32) -> (i32, i32, i32) {
    %c0_i32 = arith.constant 0 : i32
    %c0_i32_0 = arith.constant 0 : i32
    %c0_i32_1 = arith.constant 0 : i32
    return %c0_i32, %arg0, %c0_i32_0 : i32, i32, i32
  }
  func.func @transform_2(%arg0: i32) -> (i32, i32, i32) {
    %c0_i32 = arith.constant 0 : i32
    %c0_i32_0 = arith.constant 0 : i32
    %c0_i32_1 = arith.constant 0 : i32
    return %c0_i32, %arg0, %c0_i32_0 : i32, i32, i32
  }
}

</mosaic_0001>

<bundles_post_ra>
// kernel: tpu_custom_call.1
= control target key start
LH: loop header
LB: loop body
LE: loop exit
PB: predicated region body
PF: predicated region fallthrough
CT: control target
= control target key end

     0   :  { %7 = vsyncpa [#allocation5], 0  ;;  %s174_s0 = inlined_call_operand.hbm [shape: f32[2], index: 0, kind: input, shape index: {}]   ;;  %s175_s1 = inlined_call_operand.hbm [shape: f32[2,1,128], index: 1, kind: input, shape index: {}]   ;;  %s176_s2 = inlined_call_operand.hbm [shape: f32[2,1,128], index: 2, kind: output, shape index: {}]  }
   0x1   :  { %8 = vsyncpa [#allocation3], 0 }
   0x2   :  { %9 = vsyncpa [#allocation4], 0  ;;  %s15_s11 = sshll.u32 %s174_s0, 4  ;;  %s23_s14 = sshll.u32 %s175_s1, 4  ;;  %s16_s11 = int_to_ptr.hbm [resolvable:$true] %s15_s11  ;;  %s24_s14 = int_to_ptr.hbm [resolvable:$true] %s23_s14 }
   0x3   :  { %s145_s15 = smov [#allocation2]   ;;  %s146_s16 = smov [#allocation6]  }
   0x4   :  { %18 = dma.hbm_to_smem %s16_s11, 16, %s145_s15, [#allocation5]  }
   0x5   :  { %s25_s17 = sshll.u32 %s146_s16, 4  ;;  %s147_s18 = smov 16   ;;  %s26_s17 = int_to_ptr.vmem [resolvable:$true] %s25_s17 }
   0x6   :  { %s148_s19 = smov 1  }
   0x7   :  { %31 = dma.hbm_to_vmem [thread:$0]  %s24_s14, 32, %s26_s17, [#allocation3], %s147_s18, %s147_s18, %s148_s19  }
   0x8   :  { %139 = dma.done.wait [#allocation5], 16  }
   0x9   :  { %140 = vsyncadd [#allocation5], 4294967280 }
   0xa   :  { %141 = dma.done.wait [#allocation3], 32  }
   0xb   :  { %142 = vsyncadd [#allocation3], 4294967264 }
   0xc   :  { %40 = sfence }
   0xd   :  { %s41_s0 = sld [smem:[#allocation2]]  ;;  %v42_v0 = vld [vmem:[#allocation6] sm:$0x1]  ;;  %v48_v1 = vld [vmem:[#allocation6 + $0x1] sm:$0x1]  ;;  %s149_s21 = smov [#allocation7]  }
   0xe   :  { %s73_s20 = sld [smem:[#allocation2 + $0x1]]  ;;  %s57_s1 = sshll.u32 %s149_s21, 4  ;;  %s58_s1 = int_to_ptr.vmem [resolvable:$true] %s57_s1 }
   0xf   :  { %s59_s24 = sshll.u32 %s176_s2, 4  ;;  %s60_s24 = int_to_ptr.hbm [resolvable:$true] %s59_s24 }
  0x13   :  { %v43_v2 = vstv %s41_s0 }
  0x14   :  { %v44_v3 = vsub.f32 %v43_v2, %v42_v0  ;;  %v49_v4 = vstv %s73_s20 }
  0x15   :  { %v50_v5 = vsub.f32 %v49_v4, %v48_v1 }
  0x16   :  { %45 = vst [vmem:[#allocation7] sm:$0x1] %v44_v3 }
  0x17   :  { %52 = vst [vmem:[#allocation7 + $0x1] sm:$0x1] %v50_v5 }
  0x18   :  { %65 = dma.vmem_to_hbm [thread:$0]  %s58_s1, 32, %s60_s24, [#allocation4], %s147_s18, %s147_s18, %s148_s19  }
  0x19   :  { %143 = dma.done.wait [#allocation4], 32  }
  0x1a   :  { %144 = vsyncadd [#allocation4], 4294967264 }
  0x1b   :  { %70 = vsyncpa [#allocation3], 1 }
  0x1c   :  { %71 = vsyncpa [#allocation4], 1 }
  0x1d   :  { %72 = vsyncpa [#allocation5], 1 }

</bundles_post_ra>
